<compile_context>
chip_gen: v7x
topology: tpu7x:2x2x1
jax: 0.10.0
libtpu: 0.0.40
codegen_flags: <defaults>
</compile_context>

<pallas_src>
import functools

import numpy as np
import jax
import jax.numpy as jnp
from jax import lax
from jax.experimental import pallas as pl
from jax.experimental.pallas import tpu as pltpu

EPS = 1e-5


def _brm_kernel(x_ref, mfold_ref, sel_ref, b1_ref, b2_ref, bn_ref,
                out_ref, pad_ref, *, C):
    H, Lin = x_ref.shape              # Lin  = 2 * N * W * C   (256)
    Lout = out_ref.shape[-1]          # Lout =     N * W * C   (128)
    cnt = float(H * (Lout // C))      # BN reduction count = N * H * W

    x = x_ref[...].astype(jnp.float32)                       # (H, Lin)

    # ---- attention: sigmoid(conv1x1(global-avg-pool(cat[x1, xe]))) ------------
    rowsum = jnp.sum(x, axis=0, keepdims=True)                # (1, Lin): sum over H
    logits = jnp.dot(rowsum, mfold_ref[...],
                     preferred_element_type=jnp.float32)      # (1, N*2C): pool+1x1 fold
    att = jax.nn.sigmoid(logits)
    gate = jnp.dot(att, sel_ref[...],
                   preferred_element_type=jnp.float32)        # (1, Lin): tiled per lane
    gated = (x * gate).astype(jnp.bfloat16)                   # channel gating, bf16 once

    # ---- bf16 halo scratch: zero the two halo rows, write the gated rows ------
    pad_ref[0:1, :] = jnp.zeros((1, Lin), jnp.bfloat16)
    pad_ref[H + 1:H + 2, :] = jnp.zeros((1, Lin), jnp.bfloat16)
    pad_ref[1:H + 1, :] = gated

    # ---- conv3x3 #1 (2C -> C) as ONE K-stacked lane-dense MXU matmul ----------
    # taps ky=0,1,2 concatenated along K (center tap reuses the register value)
    act1 = jnp.concatenate([pad_ref[0:H, :], gated, pad_ref[2:H + 2, :]], axis=-1)
    y = jnp.dot(act1, b1_ref[...], preferred_element_type=jnp.float32)   # (H, Lout)
    y = y + x[:, :Lout]                                        # residual add with x_1

    # ---- train-mode BatchNorm (per channel over N,H,W) + ReLU, f32 ------------
    def channel_total(row):
        # (1, Lout): roll-and-add over lanes == c (mod C) -> per-channel totals,
        # already broadcast to every lane of that channel (XLU, no MXU matmuls).
        t = row
        s = C
        while s < Lout:
            t = t + pltpu.roll(t, shift=s, axis=1)
            s *= 2
        return t

    def bn_relu(v, gamma, beta):
        mu = channel_total(jnp.sum(v, axis=0, keepdims=True)) / cnt
        d = v - mu
        var = channel_total(jnp.sum(d * d, axis=0, keepdims=True)) / cnt
        return jnp.maximum(d * lax.rsqrt(var + EPS) * gamma + beta, 0.0)

    h1 = bn_relu(y, bn_ref[0:1, :], bn_ref[1:2, :])            # (H, Lout)

    # ---- conv3x3 #2 (C -> C): reuse the scratch; stale xe lanes get zero taps --
    pad_ref[1:H + 1, 0:Lout] = h1.astype(jnp.bfloat16)
    act2 = jnp.concatenate([pad_ref[0:H, :], pad_ref[1:H + 1, :],
                            pad_ref[2:H + 2, :]], axis=-1)
    z = jnp.dot(act2, b2_ref[...], preferred_element_type=jnp.float32)

    out = bn_relu(z, bn_ref[2:3, :], bn_ref[3:4, :])
    out_ref[...] = out.astype(out_ref.dtype)                   # full 128-lane store


def brm_pallas(x1, xe, wa, w1_hwio, w2_hwio, bn1, bn2):
    """x1, xe: (N, H, W, C) float32.  wa: (2C_in, 2C_out).
    w1_hwio: (3, 3, 2C, C).  w2_hwio: (3, 3, C, C).  bn*: (2, C) = [gamma; beta]."""
    N, H, W, C = x1.shape
    WC = W * C
    Lout = N * WC            # output lanes  (n, w, c)
    Lin = 2 * Lout           # input  lanes  (half, n, w, c)
    HW = H * W

    wa_np = np.asarray(wa, np.float32)
    w1_np = np.asarray(w1_hwio, np.float32)
    w2_np = np.asarray(w2_hwio, np.float32)

    # ---- host-side constant / weight-layout preprocessing (no runtime data) ----
    # pooling + 1x1-conv fold and the attention gate tiler
    mfold = np.zeros((Lin, N * 2 * C), np.float32)
    sel2b = np.zeros((N * 2 * C, Lin), np.float32)
    for half in range(2):
        for n in range(N):
            for w in range(W):
                for c in range(C):
                    lane = half * Lout + n * WC + w * C + c
                    cin = half * C + c
                    mfold[lane, n * 2 * C:(n + 1) * 2 * C] = wa_np[cin, :] / HW
                    sel2b[n * 2 * C + cin, lane] = 1.0

    def banded(wk, cin, cout):
        """(3,3,cin,cout) conv taps -> 3 block-banded (W*cin, W*cout) matrices.
        The W-direction zero padding is absorbed into the zero blocks."""
        B = np.zeros((3, W * cin, W * cout), np.float32)
        for ky in range(3):
            for w_out in range(W):
                for kx in range(3):
                    w_in = w_out + kx - 1
                    if 0 <= w_in < W:
                        B[ky, w_in * cin:(w_in + 1) * cin,
                          w_out * cout:(w_out + 1) * cout] = wk[ky, kx]
        return B

    b1_x1 = banded(w1_np[:, :, :C, :], C, C)       # x_1 half of conv_1
    b1_xe = banded(w1_np[:, :, C:, :], C, C)       # x_edge half of conv_1
    b2_w = banded(w2_np, C, C)

    # K-stacked, per-sample block-diagonal tap matrices (taps stacked along K)
    B1 = np.zeros((3, Lin, Lout), np.float32)
    B2 = np.zeros((3, Lin, Lout), np.float32)
    for ky in range(3):
        for n in range(N):
            sl_out = slice(n * WC, (n + 1) * WC)
            B1[ky, n * WC:(n + 1) * WC, sl_out] = b1_x1[ky]
            B1[ky, Lout + n * WC:Lout + (n + 1) * WC, sl_out] = b1_xe[ky]
            B2[ky, n * WC:(n + 1) * WC, sl_out] = b2_w[ky]   # lanes [Lout, Lin) stay zero
    b1s = B1.reshape(3 * Lin, Lout)
    b2s = B2.reshape(3 * Lin, Lout)

    # BN gamma/beta tiled over the (n, w, c) lane layout; both BNs in one array
    selc = np.zeros((C, Lout), np.float32)
    for n in range(N):
        for w in range(W):
            for c in range(C):
                selc[c, n * WC + w * C + c] = 1.0
    bn_all = np.concatenate([np.asarray(bn1, np.float32),
                             np.asarray(bn2, np.float32)], axis=0) @ selc   # (4, Lout)

    # lane-dense presentation: rows = H, lanes = (half, n, w, c)
    x1_l = jnp.transpose(x1, (1, 0, 2, 3)).reshape(H, Lout)
    xe_l = jnp.transpose(xe, (1, 0, 2, 3)).reshape(H, Lout)
    xcat = jnp.concatenate([x1_l, xe_l], axis=-1)                            # (H, Lin)

    kernel = functools.partial(_brm_kernel, C=C)

    out = pl.pallas_call(
        kernel,
        out_shape=jax.ShapeDtypeStruct((H, Lout), x1.dtype),
        grid_spec=pltpu.PrefetchScalarGridSpec(
            num_scalar_prefetch=0,
            grid=(1,),
            in_specs=[
                pl.BlockSpec((H, Lin), lambda i: (0, 0)),            # cat[x_1, x_edge]
                pl.BlockSpec((Lin, N * 2 * C), lambda i: (0, 0)),    # pool + 1x1 fold
                pl.BlockSpec((N * 2 * C, Lin), lambda i: (0, 0)),    # attention gate tiler
                pl.BlockSpec((3 * Lin, Lout), lambda i: (0, 0)),     # conv_1 K-stacked taps (bf16)
                pl.BlockSpec((3 * Lin, Lout), lambda i: (0, 0)),     # conv_2 K-stacked taps (bf16)
                pl.BlockSpec((4, Lout), lambda i: (0, 0)),           # bn_1/bn_2 gamma/beta tiled
            ],
            out_specs=pl.BlockSpec((H, Lout), lambda i: (0, 0)),
            scratch_shapes=[
                pltpu.VMEM((H + 2, Lin), jnp.bfloat16),              # shared bf16 H-halo scratch
            ],
        ),
        compiler_params=pltpu.CompilerParams(dimension_semantics=("arbitrary",)),
    )(xcat,
      jnp.asarray(mfold), jnp.asarray(sel2b),
      jnp.asarray(b1s, jnp.bfloat16), jnp.asarray(b2s, jnp.bfloat16),
      jnp.asarray(bn_all))

    # out rows = h, lanes = (n, w, c)  ->  (N, H, W, C)
    return jnp.transpose(out.reshape(H, N, W, C), (1, 0, 2, 3))


def brm_reference(x1, xe, wa, w1_hwio, w2_hwio, bn1, bn2):
    """Pure-JAX f32 reference matching the torch forward (train-mode BN)."""
    x = jnp.concatenate([x1, xe], axis=-1)
    att = jax.nn.sigmoid(jnp.mean(x, axis=(1, 2)) @ wa)
    out = x * att[:, None, None, :]
    dn = ('NHWC', 'HWIO', 'NHWC')
    y = lax.conv_general_dilated(out, w1_hwio, (1, 1), 'SAME', dimension_numbers=dn) + x1
    mu = jnp.mean(y, axis=(0, 1, 2)); var = jnp.mean((y - mu) ** 2, axis=(0, 1, 2))
    y = jnp.maximum((y - mu) / jnp.sqrt(var + EPS) * bn1[0] + bn1[1], 0.0)
    z = lax.conv_general_dilated(y, w2_hwio, (1, 1), 'SAME', dimension_numbers=dn)
    mu2 = jnp.mean(z, axis=(0, 1, 2)); var2 = jnp.mean((z - mu2) ** 2, axis=(0, 1, 2))
    return jnp.maximum((z - mu2) / jnp.sqrt(var2 + EPS) * bn2[0] + bn2[1], 0.0)


if __name__ == "__main__":
    N, C, H, W = 2, 4, 16, 16    # torch input would be [N, C, H, W] = [2, 4, 16, 16]

    key = jax.random.PRNGKey(0)
    k_x1, k_xe, k_wa, k_w1, k_w2 = jax.random.split(key, 5)

    # inputs in NHWC layout (== torch NCHW permuted)
    x1 = jax.random.normal(k_x1, (N, H, W, C), jnp.float32)
    xe = jax.random.normal(k_xe, (N, H, W, C), jnp.float32)

    # deterministic parameter init (kaiming-normal-style, fan_in / relu)
    w_atten_oihw = jax.random.normal(k_wa, (2 * C, 2 * C), jnp.float32) * np.sqrt(2.0 / (2 * C))
    w1_oihw = jax.random.normal(k_w1, (C, 2 * C, 3, 3), jnp.float32) * np.sqrt(2.0 / (2 * C * 9))
    w2_oihw = jax.random.normal(k_w2, (C, C, 3, 3), jnp.float32) * np.sqrt(2.0 / (C * 9))

    wa = w_atten_oihw.T                                  # (2C_in, 2C_out)
    w1_hwio = jnp.transpose(w1_oihw, (2, 3, 1, 0))       # (3, 3, 2C, C)
    w2_hwio = jnp.transpose(w2_oihw, (2, 3, 1, 0))       # (3, 3, C, C)
    bn1 = jnp.stack([jnp.ones((C,), jnp.float32), jnp.zeros((C,), jnp.float32)])
    bn2 = jnp.stack([jnp.ones((C,), jnp.float32), jnp.zeros((C,), jnp.float32)])

    out = brm_pallas(x1, xe, wa, w1_hwio, w2_hwio, bn1, bn2)
    out = jax.block_until_ready(out)

    ref = brm_reference(x1, xe, wa, w1_hwio, w2_hwio, bn1, bn2)
    assert out.shape == (N, H, W, C)
    err = float(jnp.max(jnp.abs(out - ref)))
    # bf16 at the MXU boundary only; observed error is ~1e-3..1e-2 vs. pure-f32 ref
    assert err < 3e-2, f"max abs err = {err}"

    print("KERNEL_OK")
</pallas_src>

<mosaic_0001>
module attributes {stable_mosaic.version = 11 : i64} {
  func.func @_brm_kernel(%arg0: i32, %arg1: memref<16x256xf32, #tpu.memory_space<vmem>>, %arg2: memref<256x16xf32, #tpu.memory_space<vmem>>, %arg3: memref<16x256xf32, #tpu.memory_space<vmem>>, %arg4: memref<768x128xbf16, #tpu.memory_space<vmem>>, %arg5: memref<768x128xbf16, #tpu.memory_space<vmem>>, %arg6: memref<4x128xf32, #tpu.memory_space<vmem>>, %arg7: memref<16x128xf32, #tpu.memory_space<vmem>>, %arg8: memref<18x256xbf16, #tpu.memory_space<vmem>>) attributes {dimension_semantics = [#tpu.dimension_semantics<arbitrary>], iteration_bounds = array<i64: 1>, scalar_prefetch = 0 : i64, scratch_operands = 1 : i64, tpu.core_type = #tpu.core_type<tc>, window_params = [{pipeline_mode = #tpu.pipeline_mode<synchronous>, transform_indices = @transform_0, window_bounds = array<i64: 16, 256>}, {pipeline_mode = #tpu.pipeline_mode<synchronous>, transform_indices = @transform_1, window_bounds = array<i64: 256, 16>}, {pipeline_mode = #tpu.pipeline_mode<synchronous>, transform_indices = @transform_2, window_bounds = array<i64: 16, 256>}, {pipeline_mode = #tpu.pipeline_mode<synchronous>, transform_indices = @transform_3, window_bounds = array<i64: 768, 128>}, {pipeline_mode = #tpu.pipeline_mode<synchronous>, transform_indices = @transform_4, window_bounds = array<i64: 768, 128>}, {pipeline_mode = #tpu.pipeline_mode<synchronous>, transform_indices = @transform_5, window_bounds = array<i64: 4, 128>}, {pipeline_mode = #tpu.pipeline_mode<synchronous>, transform_indices = @transform_6, window_bounds = array<i64: 16, 128>}]} {
    %c0 = arith.constant 0 : index
    %c0_0 = arith.constant 0 : index
    %0 = vector.load %arg1[%c0, %c0_0] : memref<16x256xf32, #tpu.memory_space<vmem>>, vector<16x256xf32>
    %cst = arith.constant dense<0.000000e+00> : vector<256xf32>
    %1 = vector.multi_reduction <add>, %0, %cst [0] : vector<16x256xf32> to vector<256xf32>
    %2 = vector.shape_cast %1 : vector<256xf32> to vector<1x256xf32>
    %c0_1 = arith.constant 0 : index
    %c0_2 = arith.constant 0 : index
    %3 = vector.load %arg2[%c0_1, %c0_2] : memref<256x16xf32, #tpu.memory_space<vmem>>, vector<256x16xf32>
    %cst_3 = arith.constant dense<0.000000e+00> : vector<1x16xf32>
    %4 = tpu.matmul %2, %3, %cst_3 {dimension_numbers = #tpu.dot_dimension_numbers<[1], [0], [0], [1], [0, 0, 1, 1], [], []>} : vector<1x256xf32>, vector<256x16xf32>, vector<1x16xf32> -> vector<1x16xf32>
    %5 = arith.negf %4 : vector<1x16xf32>
    %6 = math.exp %5 : vector<1x16xf32>
    %cst_4 = arith.constant 1.000000e+00 : f32
    %7 = vector.broadcast %cst_4 : f32 to vector<1x16xf32>
    %8 = arith.addf %7, %6 : vector<1x16xf32>
    %9 = arith.divf %7, %8 : vector<1x16xf32>
    %c0_5 = arith.constant 0 : index
    %c0_6 = arith.constant 0 : index
    %10 = vector.load %arg3[%c0_5, %c0_6] : memref<16x256xf32, #tpu.memory_space<vmem>>, vector<16x256xf32>
    %cst_7 = arith.constant dense<0.000000e+00> : vector<1x256xf32>
    %11 = tpu.matmul %9, %10, %cst_7 {dimension_numbers = #tpu.dot_dimension_numbers<[1], [0], [0], [1], [0, 0, 1, 1], [], []>} : vector<1x16xf32>, vector<16x256xf32>, vector<1x256xf32> -> vector<1x256xf32>
    %12 = vector.broadcast %11 : vector<1x256xf32> to vector<16x256xf32>
    %13 = arith.mulf %0, %12 : vector<16x256xf32>
    %14 = arith.truncf %13 : vector<16x256xf32> to vector<16x256xbf16>
    %cst_8 = arith.constant 0.000000e+00 : bf16
    %15 = vector.broadcast %cst_8 : bf16 to vector<1x256xbf16>
    %c0_9 = arith.constant 0 : index
    %c0_10 = arith.constant 0 : index
    %16 = vector.load %arg8[%c0_9, %c0_10] : memref<18x256xbf16, #tpu.memory_space<vmem>>, vector<1x256xbf16>
    tpu.vector_store %arg8[%c0_9, %c0_10], %15 {strides = array<i32>} : memref<18x256xbf16, #tpu.memory_space<vmem>>, vector<1x256xbf16>,
    %cst_11 = arith.constant 0.000000e+00 : bf16
    %17 = vector.broadcast %cst_11 : bf16 to vector<1x256xbf16>
    %c17 = arith.constant 17 : index
    %c0_12 = arith.constant 0 : index
    %18 = vector.load %arg8[%c17, %c0_12] : memref<18x256xbf16, #tpu.memory_space<vmem>>, vector<1x256xbf16>
    tpu.vector_store %arg8[%c17, %c0_12], %17 {strides = array<i32>} : memref<18x256xbf16, #tpu.memory_space<vmem>>, vector<1x256xbf16>,
    %c1 = arith.constant 1 : index
    %c0_13 = arith.constant 0 : index
    %19 = vector.load %arg8[%c1, %c0_13] : memref<18x256xbf16, #tpu.memory_space<vmem>>, vector<16x256xbf16>
    tpu.vector_store %arg8[%c1, %c0_13], %14 {strides = array<i32>} : memref<18x256xbf16, #tpu.memory_space<vmem>>, vector<16x256xbf16>,
    %c0_14 = arith.constant 0 : index
    %c0_15 = arith.constant 0 : index
    %20 = vector.load %arg8[%c0_14, %c0_15] : memref<18x256xbf16, #tpu.memory_space<vmem>>, vector<16x256xbf16>
    %c2 = arith.constant 2 : index
    %c0_16 = arith.constant 0 : index
    %21 = vector.load %arg8[%c2, %c0_16] : memref<18x256xbf16, #tpu.memory_space<vmem>>, vector<16x256xbf16>
    %22 = tpu.concatenate %20, %14, %21 in 1 : vector<16x256xbf16>, vector<16x256xbf16>, vector<16x256xbf16> -> vector<16x768xbf16>
    %c0_17 = arith.constant 0 : index
    %c0_18 = arith.constant 0 : index
    %23 = vector.load %arg4[%c0_17, %c0_18] : memref<768x128xbf16, #tpu.memory_space<vmem>>, vector<768x128xbf16>
    %cst_19 = arith.constant dense<0.000000e+00> : vector<16x128xf32>
    %24 = tpu.matmul %22, %23, %cst_19 {dimension_numbers = #tpu.dot_dimension_numbers<[1], [0], [0], [1], [0, 0, 1, 1], [], []>} : vector<16x768xbf16>, vector<768x128xbf16>, vector<16x128xf32> -> vector<16x128xf32>
    %25 = vector.extract_strided_slice %0 {offsets = [0, 0], sizes = [16, 128], strides = [1, 1]} : vector<16x256xf32> to vector<16x128xf32>
    %26 = arith.addf %24, %25 : vector<16x128xf32>
    %c0_20 = arith.constant 0 : index
    %c0_21 = arith.constant 0 : index
    %27 = vector.load %arg6[%c0_20, %c0_21] : memref<4x128xf32, #tpu.memory_space<vmem>>, vector<1x128xf32>
    %c1_22 = arith.constant 1 : index
    %c0_23 = arith.constant 0 : index
    %28 = vector.load %arg6[%c1_22, %c0_23] : memref<4x128xf32, #tpu.memory_space<vmem>>, vector<1x128xf32>
    %cst_24 = arith.constant dense<0.000000e+00> : vector<128xf32>
    %29 = vector.multi_reduction <add>, %26, %cst_24 [0] : vector<16x128xf32> to vector<128xf32>
    %30 = vector.shape_cast %29 : vector<128xf32> to vector<1x128xf32>
    %c4_i32 = arith.constant 4 : i32
    %31 = tpu.dynamic_rotate %30 by %c4_i32 dim 1 : vector<1x128xf32>, i32 -> vector<1x128xf32>
    %32 = arith.addf %30, %31 : vector<1x128xf32>
    %c8_i32 = arith.constant 8 : i32
    %33 = tpu.dynamic_rotate %32 by %c8_i32 dim 1 : vector<1x128xf32>, i32 -> vector<1x128xf32>
    %34 = arith.addf %32, %33 : vector<1x128xf32>
    %c16_i32 = arith.constant 16 : i32
    %35 = tpu.dynamic_rotate %34 by %c16_i32 dim 1 : vector<1x128xf32>, i32 -> vector<1x128xf32>
    %36 = arith.addf %34, %35 : vector<1x128xf32>
    %c32_i32 = arith.constant 32 : i32
    %37 = tpu.dynamic_rotate %36 by %c32_i32 dim 1 : vector<1x128xf32>, i32 -> vector<1x128xf32>
    %38 = arith.addf %36, %37 : vector<1x128xf32>
    %c64_i32 = arith.constant 64 : i32
    %39 = tpu.dynamic_rotate %38 by %c64_i32 dim 1 : vector<1x128xf32>, i32 -> vector<1x128xf32>
    %40 = arith.addf %38, %39 : vector<1x128xf32>
    %cst_25 = arith.constant 5.120000e+02 : f32
    %41 = vector.broadcast %cst_25 : f32 to vector<1x128xf32>
    %42 = arith.divf %40, %41 : vector<1x128xf32>
    %43 = vector.broadcast %42 : vector<1x128xf32> to vector<16x128xf32>
    %44 = arith.subf %26, %43 : vector<16x128xf32>
    %45 = arith.mulf %44, %44 : vector<16x128xf32>
    %cst_26 = arith.constant dense<0.000000e+00> : vector<128xf32>
    %46 = vector.multi_reduction <add>, %45, %cst_26 [0] : vector<16x128xf32> to vector<128xf32>
    %47 = vector.shape_cast %46 : vector<128xf32> to vector<1x128xf32>
    %c4_i32_27 = arith.constant 4 : i32
    %48 = tpu.dynamic_rotate %47 by %c4_i32_27 dim 1 : vector<1x128xf32>, i32 -> vector<1x128xf32>
    %49 = arith.addf %47, %48 : vector<1x128xf32>
    %c8_i32_28 = arith.constant 8 : i32
    %50 = tpu.dynamic_rotate %49 by %c8_i32_28 dim 1 : vector<1x128xf32>, i32 -> vector<1x128xf32>
    %51 = arith.addf %49, %50 : vector<1x128xf32>
    %c16_i32_29 = arith.constant 16 : i32
    %52 = tpu.dynamic_rotate %51 by %c16_i32_29 dim 1 : vector<1x128xf32>, i32 -> vector<1x128xf32>
    %53 = arith.addf %51, %52 : vector<1x128xf32>
    %c32_i32_30 = arith.constant 32 : i32
    %54 = tpu.dynamic_rotate %53 by %c32_i32_30 dim 1 : vector<1x128xf32>, i32 -> vector<1x128xf32>
    %55 = arith.addf %53, %54 : vector<1x128xf32>
    %c64_i32_31 = arith.constant 64 : i32
    %56 = tpu.dynamic_rotate %55 by %c64_i32_31 dim 1 : vector<1x128xf32>, i32 -> vector<1x128xf32>
    %57 = arith.addf %55, %56 : vector<1x128xf32>
    %cst_32 = arith.constant 5.120000e+02 : f32
    %58 = vector.broadcast %cst_32 : f32 to vector<1x128xf32>
    %59 = arith.divf %57, %58 : vector<1x128xf32>
    %cst_33 = arith.constant 9.99999974E-6 : f32
    %60 = vector.broadcast %cst_33 : f32 to vector<1x128xf32>
    %61 = arith.addf %59, %60 : vector<1x128xf32>
    %62 = math.rsqrt %61 : vector<1x128xf32>
    %63 = vector.broadcast %62 : vector<1x128xf32> to vector<16x128xf32>
    %64 = arith.mulf %44, %63 : vector<16x128xf32>
    %65 = vector.broadcast %27 : vector<1x128xf32> to vector<16x128xf32>
    %66 = arith.mulf %64, %65 : vector<16x128xf32>
    %67 = vector.broadcast %28 : vector<1x128xf32> to vector<16x128xf32>
    %68 = arith.addf %66, %67 : vector<16x128xf32>
    %cst_34 = arith.constant 0.000000e+00 : f32
    %69 = vector.broadcast %cst_34 : f32 to vector<16x128xf32>
    %70 = arith.maximumf %68, %69 : vector<16x128xf32>
    %71 = arith.truncf %70 : vector<16x128xf32> to vector<16x128xbf16>
    %c1_35 = arith.constant 1 : index
    %c0_36 = arith.constant 0 : index
    %72 = vector.load %arg8[%c1_35, %c0_36] : memref<18x256xbf16, #tpu.memory_space<vmem>>, vector<16x128xbf16>
    tpu.vector_store %arg8[%c1_35, %c0_36], %71 {strides = array<i32>} : memref<18x256xbf16, #tpu.memory_space<vmem>>, vector<16x128xbf16>,
    %c0_37 = arith.constant 0 : index
    %c0_38 = arith.constant 0 : index
    %73 = vector.load %arg8[%c0_37, %c0_38] : memref<18x256xbf16, #tpu.memory_space<vmem>>, vector<16x256xbf16>
    %c1_39 = arith.constant 1 : index
    %c0_40 = arith.constant 0 : index
    %74 = vector.load %arg8[%c1_39, %c0_40] : memref<18x256xbf16, #tpu.memory_space<vmem>>, vector<16x256xbf16>
    %c2_41 = arith.constant 2 : index
    %c0_42 = arith.constant 0 : index
    %75 = vector.load %arg8[%c2_41, %c0_42] : memref<18x256xbf16, #tpu.memory_space<vmem>>, vector<16x256xbf16>
    %76 = tpu.concatenate %73, %74, %75 in 1 : vector<16x256xbf16>, vector<16x256xbf16>, vector<16x256xbf16> -> vector<16x768xbf16>
    %c0_43 = arith.constant 0 : index
    %c0_44 = arith.constant 0 : index
    %77 = vector.load %arg5[%c0_43, %c0_44] : memref<768x128xbf16, #tpu.memory_space<vmem>>, vector<768x128xbf16>
    %cst_45 = arith.constant dense<0.000000e+00> : vector<16x128xf32>
    %78 = tpu.matmul %76, %77, %cst_45 {dimension_numbers = #tpu.dot_dimension_numbers<[1], [0], [0], [1], [0, 0, 1, 1], [], []>} : vector<16x768xbf16>, vector<768x128xbf16>, vector<16x128xf32> -> vector<16x128xf32>
    %c2_46 = arith.constant 2 : index
    %c0_47 = arith.constant 0 : index
    %79 = vector.load %arg6[%c2_46, %c0_47] : memref<4x128xf32, #tpu.memory_space<vmem>>, vector<1x128xf32>
    %c3 = arith.constant 3 : index
    %c0_48 = arith.constant 0 : index
    %80 = vector.load %arg6[%c3, %c0_48] : memref<4x128xf32, #tpu.memory_space<vmem>>, vector<1x128xf32>
    %cst_49 = arith.constant dense<0.000000e+00> : vector<128xf32>
    %81 = vector.multi_reduction <add>, %78, %cst_49 [0] : vector<16x128xf32> to vector<128xf32>
    %82 = vector.shape_cast %81 : vector<128xf32> to vector<1x128xf32>
    %c4_i32_50 = arith.constant 4 : i32
    %83 = tpu.dynamic_rotate %82 by %c4_i32_50 dim 1 : vector<1x128xf32>, i32 -> vector<1x128xf32>
    %84 = arith.addf %82, %83 : vector<1x128xf32>
    %c8_i32_51 = arith.constant 8 : i32
    %85 = tpu.dynamic_rotate %84 by %c8_i32_51 dim 1 : vector<1x128xf32>, i32 -> vector<1x128xf32>
    %86 = arith.addf %84, %85 : vector<1x128xf32>
    %c16_i32_52 = arith.constant 16 : i32
    %87 = tpu.dynamic_rotate %86 by %c16_i32_52 dim 1 : vector<1x128xf32>, i32 -> vector<1x128xf32>
    %88 = arith.addf %86, %87 : vector<1x128xf32>
    %c32_i32_53 = arith.constant 32 : i32
    %89 = tpu.dynamic_rotate %88 by %c32_i32_53 dim 1 : vector<1x128xf32>, i32 -> vector<1x128xf32>
    %90 = arith.addf %88, %89 : vector<1x128xf32>
    %c64_i32_54 = arith.constant 64 : i32
    %91 = tpu.dynamic_rotate %90 by %c64_i32_54 dim 1 : vector<1x128xf32>, i32 -> vector<1x128xf32>
    %92 = arith.addf %90, %91 : vector<1x128xf32>
    %cst_55 = arith.constant 5.120000e+02 : f32
    %93 = vector.broadcast %cst_55 : f32 to vector<1x128xf32>
    %94 = arith.divf %92, %93 : vector<1x128xf32>
    %95 = vector.broadcast %94 : vector<1x128xf32> to vector<16x128xf32>
    %96 = arith.subf %78, %95 : vector<16x128xf32>
    %97 = arith.mulf %96, %96 : vector<16x128xf32>
    %cst_56 = arith.constant dense<0.000000e+00> : vector<128xf32>
    %98 = vector.multi_reduction <add>, %97, %cst_56 [0] : vector<16x128xf32> to vector<128xf32>
    %99 = vector.shape_cast %98 : vector<128xf32> to vector<1x128xf32>
    %c4_i32_57 = arith.constant 4 : i32
    %100 = tpu.dynamic_rotate %99 by %c4_i32_57 dim 1 : vector<1x128xf32>, i32 -> vector<1x128xf32>
    %101 = arith.addf %99, %100 : vector<1x128xf32>
    %c8_i32_58 = arith.constant 8 : i32
    %102 = tpu.dynamic_rotate %101 by %c8_i32_58 dim 1 : vector<1x128xf32>, i32 -> vector<1x128xf32>
    %103 = arith.addf %101, %102 : vector<1x128xf32>
    %c16_i32_59 = arith.constant 16 : i32
    %104 = tpu.dynamic_rotate %103 by %c16_i32_59 dim 1 : vector<1x128xf32>, i32 -> vector<1x128xf32>
    %105 = arith.addf %103, %104 : vector<1x128xf32>
    %c32_i32_60 = arith.constant 32 : i32
    %106 = tpu.dynamic_rotate %105 by %c32_i32_60 dim 1 : vector<1x128xf32>, i32 -> vector<1x128xf32>
    %107 = arith.addf %105, %106 : vector<1x128xf32>
    %c64_i32_61 = arith.constant 64 : i32
    %108 = tpu.dynamic_rotate %107 by %c64_i32_61 dim 1 : vector<1x128xf32>, i32 -> vector<1x128xf32>
    %109 = arith.addf %107, %108 : vector<1x128xf32>
    %cst_62 = arith.constant 5.120000e+02 : f32
    %110 = vector.broadcast %cst_62 : f32 to vector<1x128xf32>
    %111 = arith.divf %109, %110 : vector<1x128xf32>
    %cst_63 = arith.constant 9.99999974E-6 : f32
    %112 = vector.broadcast %cst_63 : f32 to vector<1x128xf32>
    %113 = arith.addf %111, %112 : vector<1x128xf32>
    %114 = math.rsqrt %113 : vector<1x128xf32>
    %115 = vector.broadcast %114 : vector<1x128xf32> to vector<16x128xf32>
    %116 = arith.mulf %96, %115 : vector<16x128xf32>
    %117 = vector.broadcast %79 : vector<1x128xf32> to vector<16x128xf32>
    %118 = arith.mulf %116, %117 : vector<16x128xf32>
    %119 = vector.broadcast %80 : vector<1x128xf32> to vector<16x128xf32>
    %120 = arith.addf %118, %119 : vector<16x128xf32>
    %cst_64 = arith.constant 0.000000e+00 : f32
    %121 = vector.broadcast %cst_64 : f32 to vector<16x128xf32>
    %122 = arith.maximumf %120, %121 : vector<16x128xf32>
    %c0_65 = arith.constant 0 : index
    %c0_66 = arith.constant 0 : index
    %123 = vector.load %arg7[%c0_65, %c0_66] : memref<16x128xf32, #tpu.memory_space<vmem>>, vector<16x128xf32>
    tpu.vector_store %arg7[%c0_65, %c0_66], %122 {strides = array<i32>} : memref<16x128xf32, #tpu.memory_space<vmem>>, vector<16x128xf32>,
    return
  }
  func.func @transform_0(%arg0: i32) -> (i32, i32) {
    %c0_i32 = arith.constant 0 : i32
    %c0_i32_0 = arith.constant 0 : i32
    %c0_i32_1 = arith.constant 0 : i32
    return %c0_i32, %c0_i32_0 : i32, i32
  }
  func.func @transform_1(%arg0: i32) -> (i32, i32) {
    %c0_i32 = arith.constant 0 : i32
    %c0_i32_0 = arith.constant 0 : i32
    %c0_i32_1 = arith.constant 0 : i32
    return %c0_i32, %c0_i32_0 : i32, i32
  }
  func.func @transform_2(%arg0: i32) -> (i32, i32) {
    %c0_i32 = arith.constant 0 : i32
    %c0_i32_0 = arith.constant 0 : i32
    %c0_i32_1 = arith.constant 0 : i32
    return %c0_i32, %c0_i32_0 : i32, i32
  }
  func.func @transform_3(%arg0: i32) -> (i32, i32) {
    %c0_i32 = arith.constant 0 : i32
    %c0_i32_0 = arith.constant 0 : i32
    %c0_i32_1 = arith.constant 0 : i32
    return %c0_i32, %c0_i32_0 : i32, i32
  }
  func.func @transform_4(%arg0: i32) -> (i32, i32) {
    %c0_i32 = arith.constant 0 : i32
    %c0_i32_0 = arith.constant 0 : i32
    %c0_i32_1 = arith.constant 0 : i32
    return %c0_i32, %c0_i32_0 : i32, i32
  }
  func.func @transform_5(%arg0: i32) -> (i32, i32) {
    %c0_i32 = arith.constant 0 : i32
    %c0_i32_0 = arith.constant 0 : i32
    %c0_i32_1 = arith.constant 0 : i32
    return %c0_i32, %c0_i32_0 : i32, i32
  }
  func.func @transform_6(%arg0: i32) -> (i32, i32) {
    %c0_i32 = arith.constant 0 : i32
    %c0_i32_0 = arith.constant 0 : i32
    %c0_i32_1 = arith.constant 0 : i32
    return %c0_i32, %c0_i32_0 : i32, i32
  }
}

</mosaic_0001>

<bundles_post_ra>
// kernel: tpu_custom_call.1
= control target key start
LH: loop header
LB: loop body
LE: loop exit
PB: predicated region body
PF: predicated region fallthrough
CT: control target
= control target key end

     0   :  { %11 = vsyncpa [#allocation4], 0  ;;  %s2507_s0 = inlined_call_operand.vmem [shape: f32[16,256], index: 0, kind: input, shape index: {}]   ;;  %s2508_s1 = inlined_call_operand.vmem [shape: f32[256,16], index: 1, kind: input, shape index: {}]   ;;  %s2509_s2 = inlined_call_operand.vmem [shape: f32[16,256], index: 2, kind: input, shape index: {}]   ;;  %s2510_s3 = inlined_call_operand.hbm [shape: bf16[768,128], index: 3, kind: input, shape index: {}]   ;;  %s2511_s4 = inlined_call_operand.hbm [shape: bf16[768,128], index: 4, kind: input, shape index: {}]   ;;  %s2512_s5 = inlined_call_operand.vmem [shape: f32[4,128], index: 5, kind: input, shape index: {}]   ;;  %s2513_s6 = inlined_call_operand.hbm [shape: f32[16,128], index: 6, kind: output, shape index: {}]  }
   0x1   :  { %12 = vsyncpa [#allocation7], 0 }
   0x2   :  { %13 = vsyncpa [#allocation5], 0  ;;  %s2167_s21 = smov [#allocation3]   ;;  %s2095_s25 = scalar_lea.hbm %s2510_s3, 6144 }
   0x3   :  { %s25_s22 = sshll.u32 %s2167_s21, 4  ;;  %p2096_p0 = scmp.ne.s32.totalorder %s2510_s3, %s2095_s25  ;;  %s26_s22 = int_to_ptr.vmem [resolvable:$true] %s25_s22 }
   0x4   :  { %p2099_p1 = scmp.lt.u32.totalorder %s2095_s25, %s2510_s3 }
   0x6   :  { %p2101_p2 = pnand %p2099_p1, %p2096_p0 }
   0x8   :  { %2104 = shalt.err (!%p2101_p2)
}
   0x9   :  { %s2105_s30 = scalar_lea.vmem %s26_s22, 6144  ;;  %p2110_p4 = scmp.lt.s32.totalorder %s26_s22, %s26_s22 }
   0xa   :  { %p2106_p3 = scmp.ne.s32.totalorder %s26_s22, %s2105_s30  ;;  %p2111_p5 = scmp.lt.s32.totalorder %s2105_s30, %s2105_s30 }
   0xc   :  { %p2112_p6 = por %p2111_p5, %p2110_p4 }
   0xe   :  { %p2113_p7 = pnand %p2112_p6, %p2106_p3 }
  0x10   :  { %2116 = shalt.err (!%p2113_p7)
}
  0x11   :  { %s2168_s7 = smov 64   ;;  %s2169_s8 = smov 4  }
  0x12   :  { %31 = dma.hbm_to_vmem [thread:$0]  %s2510_s3, 6144, %s26_s22, [#allocation4], %s2168_s7, %s2168_s7, %s2169_s8  }
  0x13   :  { %s2170_s11 = smov [#allocation6]   ;;  %s2117_s15 = scalar_lea.hbm %s2511_s4, 6144 }
  0x14   :  { %s37_s12 = sshll.u32 %s2170_s11, 4  ;;  %p2118_p8 = scmp.ne.s32.totalorder %s2511_s4, %s2117_s15  ;;  %s38_s12 = int_to_ptr.vmem [resolvable:$true] %s37_s12 }
  0x15   :  { %p2121_p9 = scmp.lt.u32.totalorder %s2117_s15, %s2511_s4 }
  0x17   :  { %p2123_p10 = pnand %p2121_p9, %p2118_p8 }
  0x19   :  { %2126 = shalt.err (!%p2123_p10)
}
  0x1a   :  { %s2127_s20 = scalar_lea.vmem %s38_s12, 6144  ;;  %p2132_p12 = scmp.lt.s32.totalorder %s38_s12, %s38_s12 }
  0x1b   :  { %p2128_p11 = scmp.ne.s32.totalorder %s38_s12, %s2127_s20  ;;  %p2133_p13 = scmp.lt.s32.totalorder %s2127_s20, %s2127_s20 }
  0x1d   :  { %p2134_p0 = por %p2133_p13, %p2132_p12 }
  0x1f   :  { %p2135_p1 = pnand %p2134_p0, %p2128_p11 }
  0x21   :  { %2138 = shalt.err (!%p2135_p1)
}
  0x22   :  { %43 = dma.hbm_to_vmem [thread:$0]  %s2511_s4, 6144, %s38_s12, [#allocation7], %s2168_s7, %s2168_s7, %s2169_s8  }
  0x23   :  { %2161 = dma.done.wait [#allocation4], 6144  }
  0x24   :  { %2162 = vsyncadd [#allocation4], 4294961152 }
  0x25   :  { %2163 = dma.done.wait [#allocation7], 6144  }
  0x26   :  { %2164 = vsyncadd [#allocation7], 4294961152  ;;  %v87_v0 = vld [vmem:[%s2508_s1 + $0x80] sm:$0xff]  ;;  %v88_v1 = vld [vmem:[%s2508_s1 + $0x88] sm:$0xff]  ;;  %vm183_vm0 = vcmask 130048   ;;  %vm272_vm1 = vcmask 1040384  }
  0x27   :  { %v71_v2 = vld [vmem:[%s2508_s1] sm:$0xff]  ;;  %v1937_v3 = vpack.c.bf16 %v88_v1, %v87_v0  ;;  %v72_v4 = vld [vmem:[%s2508_s1 + $0x8] sm:$0xff]  ;;  %v89_v5 = vld [vmem:[%s2508_s1 + $0x90] sm:$0xff]  ;;  %vm273_vm2 = vsmask.f32 256  ;;  %vm275_vm3 = vcmask 1044484  }
  0x28   :  { %v90_v6 = vld [vmem:[%s2508_s1 + $0x98] sm:$0xff]  ;;  %v1939_v7 = vpack.c.bf16 %v72_v4, %v71_v2  ;;  %v73_v9 = vld [vmem:[%s2508_s1 + $0x10] sm:$0xff]  ;;  %v91_v11 = vld [vmem:[%s2508_s1 + $0xa0] sm:$0xff]  ;;  %vm276_vm4 = vsmask.f32 4352  ;;  %vm320_vm13 = vcmask 1043456  }
  0x29   :  { %v1941_v8 = vpack.c.bf16 %v90_v6, %v89_v5  ;;  %v74_v10 = vld [vmem:[%s2508_s1 + $0x18] sm:$0xff]  ;;  %1938 = vmatprep.subr.bf16.mxu0 %v1937_v3  ;;  %v92_v12 = vld [vmem:[%s2508_s1 + $0xa8] sm:$0xff]  ;;  %v75_v15 = vld [vmem:[%s2508_s1 + $0x20] sm:$0xff]  ;;  %vm282_vm6 = vsmask.f32 7938  ;;  %vm322_vm14 = vcmask 1047556  }
  0x2a   :  { %1940 = vmatpush3.bf16.msra.mxu0 %v1939_v7  ;;  %v1943_v13 = vpack.c.bf16 %v74_v10, %v73_v9  ;;  %v1945_v14 = vpack.c.bf16 %v92_v12, %v91_v11  ;;  %v76_v16 = vld [vmem:[%s2508_s1 + $0x28] sm:$0xff]  ;;  %v93_v17 = vld [vmem:[%s2508_s1 + $0xb0] sm:$0xff]  ;;  %v94_v18 = vld [vmem:[%s2508_s1 + $0xb8] sm:$0xff]  ;;  %v2171_v7 = vmov 0.0   ;;  %vm284_vm8 = vsmask.f32 7954 }
  0x2b   :  { %1942 = vmatprep.subr.bf16.mxu0 %v1941_v8  ;;  %v1947_v19 = vpack.c.bf16 %v76_v16, %v75_v15  ;;  %v1949_v20 = vpack.c.bf16 %v94_v18, %v93_v17  ;;  %v77_v21 = vld [vmem:[%s2508_s1 + $0x30] sm:$0xff]  ;;  %v78_v22 = vld [vmem:[%s2508_s1 + $0x38] sm:$0xff]  ;;  %v95_v23 = vld [vmem:[%s2508_s1 + $0xc0] sm:$0xff]  ;;  %251 = vmatprep.mubr.f32.mxu1 %v2171_v7  ;;  %vm298_vm15 = vsmask.f32 4368  ;;  %s2173_s27 = smov 16  }
  0x2c   :  { %v96_v24 = vld [vmem:[%s2508_s1 + $0xc8] sm:$0xff]  ;;  %v79_v26 = vld [vmem:[%s2508_s1 + $0x40] sm:$0xff]  ;;  %v2310_v28 = vld [vmem:[%s2507_s0 + $0x18] sm:$0xff]  ;;  %v1951_v31 = vpack.c.bf16 %v78_v22, %v77_v21  ;;  %s2174_s28 = smov 32  }
  0x2d   :  { %v2299_v25 = vld [vmem:[%s2507_s0 + $0x8] sm:$0xff]  ;;  %v2315_v29 = vld [vmem:[%s2507_s0] sm:$0xff]  ;;  %v2320_v30 = vld [vmem:[%s2507_s0 + $0x10] sm:$0xff]  ;;  %v1953_v36 = vpack.c.bf16 %v96_v24, %v95_v23 }
  0x2e   :  { %1944 = vmatpush3.bf16.msra.mxu0 %v1943_v13  ;;  %v80_v27 = vld [vmem:[%s2508_s1 + $0x48] sm:$0xff]  ;;  %v97_v32 = vld [vmem:[%s2508_s1 + $0xd0] sm:$0xff]  ;;  %v98_v33 = vld [vmem:[%s2508_s1 + $0xd8] sm:$0xff]  ;;  %v64_v34 = vadd.f32 %v2310_v28, %v2299_v25  ;;  %v57_v35 = vadd.f32 %v2320_v30, %v2315_v29 }
  0x2f   :  { %1946 = vmatprep.subr.bf16.mxu0 %v1945_v14  ;;  %v81_v39 = vld [vmem:[%s2508_s1 + $0x50] sm:$0xff]  ;;  %v82_v40 = vld [vmem:[%s2508_s1 + $0x58] sm:$0xff]  ;;  %v1955_v41 = vpack.c.bf16 %v80_v27, %v79_v26  ;;  %v99_v42 = vld [vmem:[%s2508_s1 + $0xe0] sm:$0xff]  ;;  %v1957_v46 = vpack.c.bf16 %v98_v33, %v97_v32 }
  0x30   :  { %v65_v37 = vrot.slane %v64_v34, 4  ;;  %v58_v38 = vrot.slane %v57_v35, 4  ;;  %v100_v43 = vld [vmem:[%s2508_s1 + $0xe8] sm:$0xff]  ;;  %v83_v49 = vld [vmem:[%s2508_s1 + $0x60] sm:$0xff]  ;;  %v1959_v51 = vpack.c.bf16 %v82_v40, %v81_v39  ;;  %v101_v52 = vld [vmem:[%s2508_s1 + $0xf0] sm:$0xff] }
  0x31   :  { %v84_v50 = vld [vmem:[%s2508_s1 + $0x68] sm:$0xff]  ;;  %v102_v53 = vld [vmem:[%s2508_s1 + $0xf8] sm:$0xff]  ;;  %v1961_v56 = vpack.c.bf16 %v100_v43, %v99_v42  ;;  %v85_v59 = vld [vmem:[%s2508_s1 + $0x70] sm:$0xff] }
  0x32   :  { %1948 = vmatpush3.bf16.msra.mxu0 %v1947_v19  ;;  %v66_v44 = vadd.f32 %v65_v37, %v64_v34  ;;  %v59_v45 = vadd.f32 %v58_v38, %v57_v35  ;;  %v86_v60 = vld [vmem:[%s2508_s1 + $0x78] sm:$0xff]  ;;  %v1963_v61 = vpack.c.bf16 %v84_v50, %v83_v49  ;;  %v1965_v63 = vpack.c.bf16 %v102_v53, %v101_v52  ;;  %v180_v2 = vld [vmem:[%s2509_s2 + $0x8] sm:$0xff]  ;;  %v179_v4 = vld [vmem:[%s2509_s2] sm:$0xff] }
  0x33   :  { %1950 = vmatprep.subr.bf16.mxu0 %v1949_v20  ;;  %v1967_v0 = vpack.c.bf16 %v86_v60, %v85_v59  ;;  %v182_v3 = vld [vmem:[%s2509_s2 + $0x18] sm:$0xff]  ;;  %v181_v6 = vld [vmem:[%s2509_s2 + $0x10] sm:$0xff]  ;;  %v1985_v11 = vld [vmem:[#allocation3 + $0xc8] sm:$0xff]   ;;  %v258_v59 = vlaneseq  ;;  %s2172_s2 = smov 8  }
  0x34   :  { %v67_v47 = vrot.slane %v66_v44, 2  ;;  %v60_v48 = vrot.slane %v59_v45, 2  ;;  %v1969_v5 = vpack.c.bf16 %v182_v3, %v180_v2  ;;  %v1971_v8 = vpack.c.bf16 %v181_v6, %v179_v4  ;;  %v1983_v9 = vld [vmem:[#allocation3 + $0xc0] sm:$0xff]   ;;  %v1986_v13 = vld [vmem:[#allocation3 + $0x88] sm:$0xff]   ;;  %v1987_v14 = vld [vmem:[#allocation3 + $0xd0] sm:$0xff]  }
  0x35   :  { %v1984_v10 = vld [vmem:[#allocation3 + $0x80] sm:$0xff]   ;;  %v1988_v15 = vld [vmem:[#allocation3 + $0x90] sm:$0xff]   ;;  %v1989_v16 = vld [vmem:[#allocation3 + $0xd8] sm:$0xff]   ;;  %v259_v60 = vshrl.u32 %v258_v59, 7 }
  0x36   :  { %1952 = vmatpush3.bf16.msra.mxu0 %v1951_v31  ;;  %v68_v54 = vadd.f32 %v67_v47, %v66_v44  ;;  %v61_v55 = vadd.f32 %v60_v48, %v59_v45  ;;  %1970 = vmatprep.subr.bf16.mxu1 %v1969_v5  ;;  %v1991_v12 = vld [vmem:[#allocation3 + $0x40] sm:$0xff]   ;;  %v1990_v17 = vld [vmem:[#allocation3 + $0x98] sm:$0xff]   ;;  %v1996_v20 = vld [vmem:[#allocation3 + $0xe8] sm:$0xff]  }
  0x37   :  { %1954 = vmatprep.subr.bf16.mxu0 %v1953_v36  ;;  %1972 = vmatpush1.bf16.msra.mxu1 %v1971_v8  ;;  %v1992_v18 = vld [vmem:[#allocation3 + $0xe0] sm:$0xff]   ;;  %v1998_v21 = vld [vmem:[#allocation3 + $0xa8] sm:$0xff]   ;;  %v1999_v36 = vld [vmem:[#allocation3 + $0x50] sm:$0xff]  }
  0x38   :  { %v69_v57 = vrot.slane %v68_v54, 1  ;;  %v62_v58 = vrot.slane %v61_v55, 1  ;;  %1805 = vmatprep.subr.bf16.mxu1 %v1991_v12  ;;  %v1994_v19 = vld [vmem:[#allocation3 + $0xa0] sm:$0xff]   ;;  %v1995_v33 = vld [vmem:[#allocation3 + $0x48] sm:$0xff]   ;;  %v2001_v37 = vld [vmem:[#allocation3 + $0x10] sm:$0xff]  }
  0x39   :  { %v1993_v32 = vld [vmem:[#allocation3] sm:$0xff]   ;;  %v1997_v35 = vld [vmem:[#allocation3 + $0x8] sm:$0xff]   ;;  %v2003_v38 = vld [vmem:[#allocation3 + $0x58] sm:$0xff]  }
  0x3a   :  { %1956 = vmatpush3.bf16.msra.mxu0 %v1955_v41  ;;  %v70_v62 = vadd.f32 %v69_v57, %v68_v54  ;;  %v63_v1 = vadd.f32 %v62_v58, %v61_v55  ;;  %v2005_v39 = vld [vmem:[#allocation3 + $0x18] sm:$0xff]   ;;  %v2000_v40 = vld [vmem:[#allocation3 + $0xf0] sm:$0xff]   ;;  %v2007_v41 = vld [vmem:[#allocation3 + $0x60] sm:$0xff]  }
  0x3b   :  { %1958 = vmatprep.subr.bf16.mxu0 %v1957_v46  ;;  %v2002_v42 = vld [vmem:[#allocation3 + $0xb0] sm:$0xff]   ;;  %v2008_v43 = vld [vmem:[#allocation3 + $0x20] sm:$0xff]   ;;  %vm2376_vm5 = vmand %vm272_vm1, %vm273_vm2 }
  0x3c   :  { %167 = vmatprep.mubr.f32.mxu0 %v70_v62  ;;  %v2004_v45 = vld [vmem:[#allocation3 + $0xf8] sm:$0xff]   ;;  %v2009_v46 = vld [vmem:[#allocation3 + $0x68] sm:$0xff]   ;;  %vm2381_vm7 = vmand %vm275_vm3, %vm276_vm4 }
  0x3d   :  { %v279_v48 = vld [vmem:[#allocation2] sm:$0x11]  ;;  %vm278_vm9 = vmor %vm2381_vm7, %vm2376_vm5  ;;  %v2006_v49 = vld [vmem:[#allocation3 + $0xb8] sm:$0xff]  }
  0x3e   :  { %1960 = vmatpush3.bf16.msra.mxu0 %v1959_v51  ;;  %v2010_v50 = vld [vmem:[#allocation3 + $0x28] sm:$0xff]   ;;  %v280_v51 = vsel %vm278_vm9, 0, %v279_v48  ;;  %vm283_vm10 = vmand %vm272_vm1, %vm282_vm6  ;;  %v287_v52 = vld [vmem:[#allocation2 + $0x10] sm:$0x11] }
  0x3f   :  { %1962 = vmatprep.subr.bf16.mxu0 %v1961_v56  ;;  %281 = vst [vmem:[#allocation2] sm:$0x11] %v280_v51  ;;  %vm285_vm11 = vmand %vm275_vm3, %vm284_vm8  ;;  %v2011_v53 = vld [vmem:[#allocation3 + $0x70] sm:$0xff]   ;;  %v2013_v56 = vld [vmem:[#allocation3 + $0x78] sm:$0xff]  }
  0x40   :  { %vm286_vm12 = vmor %vm285_vm11, %vm283_vm10  ;;  %v2012_v54 = vld [vmem:[#allocation3 + $0x30] sm:$0xff]   ;;  %v2014_v57 = vld [vmem:[#allocation3 + $0x38] sm:$0xff]  }
  0x41   :  { %v288_v55 = vsel %vm286_vm12, 0, %v287_v52  ;;  %v2015_v58 = vld [vmem:[#allocation3 + $0x140] sm:$0xff]   ;;  %vm2412_vm1 = vmand %vm322_vm14, %vm284_vm8  ;;  %v2028_v51 = vld [vmem:[#allocation3 + $0x170] sm:$0xff]  }
  0x42   :  { %1964 = vmatpush3.bf16.msra.mxu0 %v1963_v61  ;;  %289 = vst [vmem:[#allocation2 + $0x10] sm:$0x11] %v288_v55  ;;  %v2398_v61 = vsub.s32 0, %v259_v60  ;;  %vm2417_vm3 = vmor %vm273_vm2, %vm298_vm15  ;;  %vm356_vm2 = vcmask 1046528   ;;  %v2024_v47 = vld [vmem:[#allocation3 + $0x160] sm:$0xff]   ;;  %v2029_v52 = vld [vmem:[#allocation3 + $0x130] sm:$0xff]  }
  0x43   :  { %1966 = vmatprep.subr.bf16.mxu0 %v1965_v63  ;;  %v2025_v48 = vld [vmem:[#allocation3 + $0x120] sm:$0xff]  }
  0x46   :  { %1968 = vmatpush3.bf16.msra.mxu0 %v1967_v0 }
  0x47   :  { %1827 = vmatprep.subr.bf16.mxu0 %v1983_v9 }
  0x49   :  { %168 = vmatmul.mubr.f32.vlgmr.msra.gmra.mrb[0].mxu0 %v63_v1 }
  0x4a   :  { %1828 = vmatpush3.bf16.msra.mxu0 %v1984_v10 }
  0x4b   :  { %1829 = vmatprep.subr.bf16.mxu0 %v1985_v11 }
  0x4e   :  { %1830 = vmatpush3.bf16.msra.mxu0 %v1986_v13 }
  0x4f   :  { %1831 = vmatprep.subr.bf16.mxu0 %v1987_v14 }
  0x52   :  { %1832 = vmatpush3.bf16.msra.mxu0 %v1988_v15 }
  0x53   :  { %1833 = vmatprep.subr.bf16.mxu0 %v1989_v16 }
  0x56   :  { %1834 = vmatpush3.bf16.msra.mxu0 %v1990_v17  ;;  %v325_v17 = vld [vmem:[#allocation2] sm:$0xff] }
  0x57   :  { %1835 = vmatprep.subr.bf16.mxu0 %v1992_v18  ;;  %v329_v18 = vld [vmem:[#allocation2 + $0x10] sm:$0x11] }
  0x5a   :  { %1836 = vmatpush3.bf16.msra.mxu0 %v1994_v19 }
  0x5b   :  { %1837 = vmatprep.subr.bf16.mxu0 %v1996_v20 }
  0x5e   :  { %1838 = vmatpush3.bf16.msra.mxu0 %v1998_v21 }
  0x5f   :  { %1839 = vmatprep.subr.bf16.mxu0 %v2000_v40  ;;  %v2021_v40 = vld [vmem:[#allocation3 + $0x110] sm:$0xff]  }
  0x62   :  { %1840 = vmatpush3.bf16.msra.mxu0 %v2002_v42 }
  0x63   :  { %1841 = vmatprep.subr.bf16.mxu0 %v2004_v45 }
  0x66   :  { %1842 = vmatpush3.bf16.msra.mxu0 %v2006_v49  ;;  %v2026_v49 = vld [vmem:[#allocation3 + $0x168] sm:$0xff]  }
 0x11c   :  { %v1802_v22 = vpop.f32.mrb[0].mxu0 }
 0x11d   :  { %v1803_v23 = vpop.f32.mrb[1].mxu0 }
 0x11e   :  { %v1804_v24 = vadd.f32 %v1803_v23, %v1802_v22 }
 0x120   :  { %v1648_v26 = vmul.f32 -1.442695, %v1804_v24 }
 0x122   :  { %2087 = vpow2.f32 %v1648_v26 }
 0x12c   :  { %v2088_v27 = vpop.eup %2087 }
 0x12d   :  { %v176_v31 = vadd.f32 1.0, %v2088_v27 }
 0x12f   :  { %2089 = vrcp.f32 %v176_v31 }
 0x139   :  { %v2090_v34 = vpop.eup %2089 }
 0x13a   :  { %1649 = vmatmul.mubr.msk.f32.vlgmr.msra.gmra.mrb[0].mxu1 %vm183_vm0, %v2090_v34  ;;  %vm2407_vm0 = vmand %vm320_vm13, %vm282_vm6  ;;  %v2019_v34 = vld [vmem:[#allocation3 + $0x108] sm:$0xff]  }
 0x13b   :  { %1806 = vmatpush3.bf16.msra.mxu1 %v1993_v32  ;;  %vm324_vm4 = vmor %vm2412_vm1, %vm2407_vm0  ;;  %v2016_v32 = vld [vmem:[#allocation3 + $0x100] sm:$0xff]  }
 0x13c   :  { %1807 = vmatprep.subr.bf16.mxu1 %v1995_v33  ;;  %v2018_v33 = vld [vmem:[#allocation3 + $0x148] sm:$0xff]  }
 0x13f   :  { %1808 = vmatpush3.bf16.msra.mxu1 %v1997_v35  ;;  %v2020_v35 = vld [vmem:[#allocation3 + $0x150] sm:$0xff]  }
 0x140   :  { %1809 = vmatprep.subr.bf16.mxu1 %v1999_v36 }
 0x143   :  { %1810 = vmatpush3.bf16.msra.mxu1 %v2001_v37 }
 0x144   :  { %1811 = vmatprep.subr.bf16.mxu1 %v2003_v38 }
 0x147   :  { %1812 = vmatpush3.bf16.msra.mxu1 %v2005_v39 }
 0x148   :  { %1813 = vmatprep.subr.bf16.mxu1 %v2007_v41  ;;  %v2022_v41 = vld [vmem:[#allocation3 + $0x158] sm:$0xff]  }
 0x14b   :  { %1814 = vmatpush3.bf16.msra.mxu1 %v2008_v43 }
 0x14c   :  { %1815 = vmatprep.subr.bf16.mxu1 %v2009_v46  ;;  %v2023_v46 = vld [vmem:[#allocation3 + $0x118] sm:$0xff]  }
 0x14f   :  { %1816 = vmatpush3.bf16.msra.mxu1 %v2010_v50  ;;  %v2027_v50 = vld [vmem:[#allocation3 + $0x128] sm:$0xff]  }
 0x150   :  { %1817 = vmatprep.subr.bf16.mxu1 %v2011_v53  ;;  %v2030_v53 = vld [vmem:[#allocation3 + $0x178] sm:$0xff]  }
 0x153   :  { %1818 = vmatpush3.bf16.msra.mxu1 %v2012_v54 }
 0x154   :  { %1819 = vmatprep.subr.bf16.mxu1 %v2013_v56  ;;  %v2031_v56 = vld [vmem:[#allocation3 + $0x138] sm:$0xff]  }
 0x157   :  { %1820 = vmatpush3.bf16.msra.mxu1 %v2014_v57 }
 0x158   :  { %1849 = vmatprep.subr.bf16.mxu1 %v2015_v58 }
 0x20d   :  { %v253_v62 = vpop.f32.mrb[0].mxu1 }
 0x20e   :  { %v261_v63 = vrot.slane %v253_v62, %v2398_v61  ;;  %v255_v0 = vpop.f32.mrb[1].mxu1 }
 0x20f   :  { %v265_v1 = vrot.slane %v255_v0, %v2398_v61 }
 0x210   :  { %v266_v2 = vmul.f32 %v261_v63, %v2315_v29  ;;  %v268_v3 = vmul.f32 %v261_v63, %v2320_v30 }
 0x211   :  { %v267_v4 = vmul.f32 %v265_v1, %v2299_v25  ;;  %v269_v5 = vmul.f32 %v265_v1, %v2310_v28 }
 0x212   :  { %v270_v9 = vpack.c.bf16 %v268_v3, %v266_v2 }
 0x213   :  { %v1766_v6 = vpack.c.bf16 %v267_v4, %v266_v2  ;;  %v1767_v7 = vpack.c.bf16 %v269_v5, %v268_v3  ;;  %v271_v8 = vpack.c.bf16 %v269_v5, %v267_v4 }
 0x215   :  { %v301_v11 = vshrl.u32 %v1766_v6, 16  ;;  %v309_v12 = vshrl.u32 %v1767_v7, 16  ;;  %822 = vmatprep.mubr.bf16.mxu0 %v271_v8  ;;  %v304_v14 = vshll.u32 %v1766_v6, 16  ;;  %v312_v16 = vshll.u32 %v1767_v7, 16 }
 0x216   :  { %823 = vmatmul.mubr.bf16.vlgmr.msra.gmra.mrb[4].mxu0 %v270_v9 }
 0x217   :  { %v303_v28 = vrot.slane %v301_v11, 7  ;;  %v311_v15 = vrot.slane %v309_v12, 7 }
 0x219   :  { %v306_v19 = vor.u32 %v304_v14, %v303_v28  ;;  %v307_v20 = vrot.slane %v303_v28, 4  ;;  %v314_v21 = vor.u32 %v312_v16, %v311_v15  ;;  %v316_v22 = vrot.slane %v311_v15, 4 }
 0x21b   :  { %v315_v23 = vsel %vm2417_vm3, %v307_v20, %v314_v21  ;;  %v326_v24 = vsel %vm324_vm4, %v306_v19, %v325_v17  ;;  %v330_v26 = vsel %vm278_vm9, %v316_v22, %v329_v18 }
 0x21c   :  { %327 = vst [vmem:[#allocation2] sm:$0xff] %v326_v24  ;;  %328 = vst [vmem:[#allocation2 + $0x8] sm:$0xff] %v315_v23  ;;  %v1653_v27 = vcombine.high %v326_v24, %v315_v23  ;;  %v1652_v31 = vcombine.low %v326_v24, %v315_v23 }
 0x21d   :  { %331 = vst [vmem:[#allocation2 + $0x10] sm:$0x11] %v330_v26 }
 0x21e   :  { %781 = vmatprep.mubr.bf16.mxu1 %v1653_v27 }
 0x21f   :  { %782 = vmatmul.mubr.bf16.vlgmr.msra.gmra.mrb[4].mxu1 %v1652_v31 }
 0x220   :  { %1850 = vmatpush3.bf16.msra.mxu1 %v2016_v32 }
 0x221   :  { %1851 = vmatprep.subr.bf16.mxu1 %v2018_v33 }
 0x223   :  { %v334_v36 = vld [vmem:[#allocation2] sm:$0xee] }
 0x224   :  { %v335_v37 = vld [vmem:[#allocation2 + $0x10] sm:$0x11]  ;;  %v1655_v38 = vcombine.high %v334_v36, %v315_v23  ;;  %1852 = vmatpush3.bf16.msra.mxu1 %v2019_v34  ;;  %v1654_v54 = vcombine.low %v334_v36, %v315_v23 }
 0x225   :  { %v1657_v39 = vcombine.high %v335_v37, %v335_v37  ;;  %1853 = vmatprep.subr.bf16.mxu1 %v2020_v35  ;;  %v1656_v55 = vcombine.low %v335_v37, %v335_v37 }
 0x226   :  { %v360_v42 = vrot.slane %v1655_v38, 1  ;;  %v357_v57 = vrot.slane %v1654_v54, 1 }
 0x227   :  { %v361_v43 = vrot.slane %v1657_v39, 1  ;;  %v358_v58 = vrot.slane %v1656_v55, 1 }
 0x228   :  { %1854 = vmatpush3.bf16.msra.mxu1 %v2021_v40 }
 0x229   :  { %v362_v45 = vsel %vm356_vm2, %v360_v42, %v361_v43  ;;  %1855 = vmatprep.subr.bf16.mxu1 %v2022_v41  ;;  %v359_v59 = vsel %vm356_vm2, %v357_v57, %v358_v58 }
 0x22a   :  { %863 = vmatprep.mubr.bf16.mxu1 %v362_v45 }
 0x22c   :  { %1856 = vmatpush3.bf16.msra.mxu1 %v2023_v46 }
 0x22d   :  { %1857 = vmatprep.subr.bf16.mxu1 %v2024_v47 }
 0x230   :  { %1858 = vmatpush3.bf16.msra.mxu1 %v2025_v48 }
 0x231   :  { %1859 = vmatprep.subr.bf16.mxu1 %v2026_v49 }
 0x234   :  { %1860 = vmatpush3.bf16.msra.mxu1 %v2027_v50 }
 0x235   :  { %1861 = vmatprep.subr.bf16.mxu1 %v2028_v51 }
 0x238   :  { %1862 = vmatpush3.bf16.msra.mxu1 %v2029_v52 }
 0x239   :  { %1863 = vmatprep.subr.bf16.mxu1 %v2030_v53 }
 0x23c   :  { %1864 = vmatpush3.bf16.msra.mxu1 %v2031_v56 }
 0x23f   :  { %864 = vmatmul.mubr.bf16.vlgmr.msra.gmra.mrb[8].mxu1 %v359_v59 }
 0x2e9   :  { %v1843_v60 = vpop.f32.mrb[4].mxu0 }
 0x2ea   :  { %v1844_v62 = vpop.f32.mrb[5].mxu0 }
 0x2eb   :  { %v1845_v63 = vadd.f32 %v1844_v62, %v1843_v60  ;;  %v1846_v0 = vpop.f32.mrb[6].mxu0 }
 0x2ec   :  { %v1847_v1 = vpop.f32.mrb[7].mxu0 }
 0x2ed   :  { %v1848_v2 = vadd.f32 %v1847_v1, %v1846_v0  ;;  %v2034_v0 = vld [vmem:[#allocation6] sm:$0xff]   ;;  %v2035_v1 = vld [vmem:[#allocation6 + $0x48] sm:$0xff]  }
 0x2f2   :  { %v1821_v3 = vpop.f32.mrb[4].mxu1 }
 0x2f3   :  { %v1822_v4 = vpop.f32.mrb[5].mxu1 }
 0x2f4   :  { %v1823_v5 = vadd.f32 %v1822_v4, %v1821_v3  ;;  %v1824_v6 = vpop.f32.mrb[6].mxu1  ;;  %v2037_v3 = vld [vmem:[#allocation6 + $0x50] sm:$0xff]   ;;  %v2038_v4 = vld [vmem:[#allocation6 + $0xc0] sm:$0xff]  }
 0x2f5   :  { %v1825_v7 = vpop.f32.mrb[7].mxu1  ;;  %1893 = vmatprep.subr.bf16.mxu1 %v2038_v4 }
 0x2f6   :  { %v784_v8 = vadd.f32 %v1823_v5, %v2315_v29  ;;  %v1826_v9 = vadd.f32 %v1825_v7, %v1824_v6  ;;  %v2039_v5 = vld [vmem:[#allocation6 + $0x10] sm:$0xff]   ;;  %v2040_v6 = vld [vmem:[#allocation6 + $0x80] sm:$0xff]   ;;  %v2041_v7 = vld [vmem:[#allocation6 + $0x58] sm:$0xff]  }
 0x2f7   :  { %1894 = vmatpush3.bf16.msra.mxu1 %v2040_v6 }
 0x2f8   :  { %v787_v11 = vadd.f32 %v1826_v9, %v2320_v30  ;;  %v825_v12 = vadd.f32 %v1845_v63, %v784_v8  ;;  %v2033_v63 = vld [vmem:[#allocation6 + $0x40] sm:$0xff]   ;;  %v2042_v8 = vld [vmem:[#allocation6 + $0xc8] sm:$0xff]   ;;  %v2043_v9 = vld [vmem:[#allocation6 + $0x18] sm:$0xff]  }
 0x2f9   :  { %1871 = vmatprep.subr.bf16.mxu0 %v2033_v63  ;;  %1895 = vmatprep.subr.bf16.mxu1 %v2042_v8 }
 0x2fa   :  { %v828_v13 = vadd.f32 %v1848_v2, %v787_v11  ;;  %1872 = vmatpush3.bf16.msra.mxu0 %v2034_v0  ;;  %v2036_v2 = vld [vmem:[#allocation6 + $0x8] sm:$0xff]  }
 0x2fb   :  { %1873 = vmatprep.subr.bf16.mxu0 %v2035_v1  ;;  %v2044_v11 = vld [vmem:[#allocation6 + $0x88] sm:$0xff]   ;;  %v981_v1 = vld [vmem:[#allocation2 + $0x10] sm:$0x1] }
 0x2fc   :  { %1896 = vmatpush3.bf16.msra.mxu1 %v2044_v11  ;;  %v977_v0 = vld [vmem:[#allocation2] sm:$0xf]  ;;  %v2066_v11 = vld [vmem:[#allocation6 + $0x100] sm:$0xff]  }
 0x2fe   :  { %1874 = vmatpush3.bf16.msra.mxu0 %v2036_v2 }
 0x2ff   :  { %1875 = vmatprep.subr.bf16.mxu0 %v2037_v3 }
 0x302   :  { %1876 = vmatpush3.bf16.msra.mxu0 %v2039_v5 }
 0x303   :  { %1877 = vmatprep.subr.bf16.mxu0 %v2041_v7 }
 0x306   :  { %1878 = vmatpush3.bf16.msra.mxu0 %v2043_v9 }
 0x312   :  { %v1865_v28 = vpop.f32.mrb[8].mxu1 }
 0x313   :  { %v1866_v14 = vpop.f32.mrb[9].mxu1 }
 0x314   :  { %v1867_v15 = vadd.f32 %v1866_v14, %v1865_v28  ;;  %v1868_v16 = vpop.f32.mrb[10].mxu1  ;;  %v2047_v28 = vld [vmem:[#allocation6 + $0x20] sm:$0xff]   ;;  %v2048_v14 = vld [vmem:[#allocation6 + $0x90] sm:$0xff]  }
 0x315   :  { %v1869_v17 = vpop.f32.mrb[11].mxu1 }
 0x316   :  { %v866_v18 = vadd.f32 %v1867_v15, %v825_v12  ;;  %v1870_v19 = vadd.f32 %v1869_v17, %v1868_v16  ;;  %v2045_v12 = vld [vmem:[#allocation6 + $0x60] sm:$0xff]   ;;  %v2049_v15 = vld [vmem:[#allocation6 + $0x68] sm:$0xff]   ;;  %v2050_v16 = vld [vmem:[#allocation6 + $0xd8] sm:$0xff]  }
 0x317   :  { %1879 = vmatprep.subr.bf16.mxu0 %v2045_v12  ;;  %v2051_v17 = vld [vmem:[#allocation6 + $0x28] sm:$0xff]  }
 0x318   :  { %v869_v20 = vadd.f32 %v1870_v19, %v828_v13  ;;  %v2046_v13 = vld [vmem:[#allocation6 + $0xd0] sm:$0xff]   ;;  %1880 = vmatpush3.bf16.msra.mxu0 %v2047_v28 }
 0x319   :  { %1897 = vmatprep.subr.bf16.mxu1 %v2046_v13  ;;  %1881 = vmatprep.subr.bf16.mxu0 %v2049_v15  ;;  %v2053_v19 = vld [vmem:[#allocation6 + $0x70] sm:$0xff]  }
 0x31a   :  { %v874_v21 = vadd.f32 %v869_v20, %v866_v18  ;;  %1898 = vmatpush3.bf16.msra.mxu1 %v2048_v14  ;;  %v2071_v14 = vld [vmem:[#allocation6 + $0x148] sm:$0xff]  }
 0x31b   :  { %1899 = vmatprep.subr.bf16.mxu1 %v2050_v16 }
 0x31c   :  { %v875_v22 = vrot.slane %v874_v21, 4  ;;  %1882 = vmatpush3.bf16.msra.mxu0 %v2051_v17 }
 0x31d   :  { %1883 = vmatprep.subr.bf16.mxu0 %v2053_v19  ;;  %v2073_v19 = vld [vmem:[#allocation6 + $0x108] sm:$0xff]  }
 0x31e   :  { %v876_v23 = vadd.f32 %v875_v22, %v874_v21  ;;  %v2055_v21 = vld [vmem:[#allocation6 + $0x30] sm:$0xff]   ;;  %v2056_v22 = vld [vmem:[#allocation6 + $0xa0] sm:$0xff]  }
 0x320   :  { %v877_v24 = vrot.slane %v876_v23, 2  ;;  %1884 = vmatpush3.bf16.msra.mxu0 %v2055_v21 }
 0x322   :  { %v878_v26 = vadd.f32 %v877_v24, %v876_v23  ;;  %v2057_v23 = vld [vmem:[#allocation6 + $0x78] sm:$0xff]   ;;  %v2058_v24 = vld [vmem:[#allocation6 + $0xe8] sm:$0xff]  }
 0x323   :  { %1885 = vmatprep.subr.bf16.mxu0 %v2057_v23 }
 0x324   :  { %v879_v27 = vrot.slane %v878_v26, 1 }
 0x326   :  { %v880_v29 = vadd.f32 %v879_v27, %v878_v26  ;;  %v2059_v26 = vld [vmem:[#allocation6 + $0x38] sm:$0xff]   ;;  %v2060_v27 = vld [vmem:[#allocation6 + $0xa8] sm:$0xff]  }
 0x327   :  { %1886 = vmatpush3.bf16.msra.mxu0 %v2059_v26  ;;  %v2074_v26 = vld [vmem:[#allocation6 + $0x150] sm:$0xff]  }
 0x328   :  { %881 = vrot.lane.b32.xlu0 %v880_v29, %s2169_s8 }
 0x39a   :  { %v882_v30 = vpop.permute.xlu0 %881 }
 0x39b   :  { %v883_v31 = vadd.f32 %v882_v30, %v880_v29  ;;  %v2063_v29 = vld [vmem:[#allocation6 + $0xf0] sm:$0xff]   ;;  %v2064_v30 = vld [vmem:[#allocation6 + $0x140] sm:$0xff]  }
 0x39c   :  { %1915 = vmatprep.subr.bf16.mxu0 %v2064_v30 }
 0x39d   :  { %884 = vrot.lane.b32.xlu0 %v883_v31, %s2172_s2 }
 0x40f   :  { %v885_v32 = vpop.permute.xlu0 %884 }
 0x410   :  { %v886_v33 = vadd.f32 %v885_v32, %v883_v31  ;;  %v2065_v31 = vld [vmem:[#allocation6 + $0xb0] sm:$0xff]   ;;  %v2070_v32 = vld [vmem:[#allocation6 + $0xf8] sm:$0xff]  }
 0x412   :  { %887 = vrot.lane.b32.xlu1 %v886_v33, %s2173_s27 }
 0x484   :  { %v888_v34 = vpop.permute.xlu1 %887 }
 0x485   :  { %v889_v35 = vadd.f32 %v888_v34, %v886_v33  ;;  %v2072_v33 = vld [vmem:[#allocation6 + $0xb8] sm:$0xff]  }
 0x487   :  { %890 = vrot.lane.b32.xlu1 %v889_v35, %s2174_s28 }
 0x4f9   :  { %v891_v36 = vpop.permute.xlu1 %890 }
 0x4fa   :  { %v892_v37 = vadd.f32 %v891_v36, %v889_v35 }
 0x4fc   :  { %893 = vrot.lane.b32.xlu0 %v892_v37, %s2168_s7 }
 0x56e   :  { %v894_v38 = vpop.permute.xlu0 %893 }
 0x56f   :  { %v895_v39 = vadd.f32 %v894_v38, %v892_v37 }
 0x571   :  { %v897_v40 = vmul.f32 0.001953125, %v895_v39 }
 0x573   :  { %v901_v41 = vrot.slane %v897_v40, %v2398_v61  ;;  %v1706_v40 = vld [vmem:[%s2512_s5] ss:$0 sm:$0xff] }
 0x575   :  { %v2442_v42 = vsub.f32 %v866_v18, %v901_v41  ;;  %v2444_v43 = vsub.f32 %v869_v20, %v901_v41  ;;  %v2052_v18 = vld [vmem:[#allocation6 + $0x98] sm:$0xff]   ;;  %v2054_v20 = vld [vmem:[#allocation6 + $0xe0] sm:$0xff]  }
 0x576   :  { %1900 = vmatpush3.bf16.msra.mxu1 %v2052_v18 }
 0x577   :  { %v904_v45 = vmul.f32 %v2442_v42, %v2442_v42  ;;  %v905_v46 = vmul.f32 %v2444_v43, %v2444_v43  ;;  %1901 = vmatprep.subr.bf16.mxu1 %v2054_v20 }
 0x579   :  { %v906_v47 = vadd.f32 %v905_v46, %v904_v45  ;;  %v1707_v46 = vld [vmem:[%s2512_s5 + $0x1] ss:$0 sm:$0xff] }
 0x57a   :  { %1902 = vmatpush3.bf16.msra.mxu1 %v2056_v22 }
 0x57b   :  { %v907_v48 = vrot.slane %v906_v47, 4  ;;  %1903 = vmatprep.subr.bf16.mxu1 %v2058_v24 }
 0x57d   :  { %v908_v49 = vadd.f32 %v907_v48, %v906_v47 }
 0x57e   :  { %1904 = vmatpush3.bf16.msra.mxu1 %v2060_v27 }
 0x57f   :  { %v909_v50 = vrot.slane %v908_v49, 2  ;;  %1905 = vmatprep.subr.bf16.mxu1 %v2063_v29 }
 0x581   :  { %v910_v51 = vadd.f32 %v909_v50, %v908_v49 }
 0x582   :  { %1906 = vmatpush3.bf16.msra.mxu1 %v2065_v31 }
 0x583   :  { %v911_v52 = vrot.slane %v910_v51, 1  ;;  %1907 = vmatprep.subr.bf16.mxu1 %v2070_v32 }
 0x585   :  { %v912_v53 = vadd.f32 %v911_v52, %v910_v51 }
 0x586   :  { %1908 = vmatpush3.bf16.msra.mxu1 %v2072_v33  ;;  %v2075_v33 = vld [vmem:[#allocation6 + $0x110] sm:$0xff]  }
 0x587   :  { %913 = vrot.lane.b32.xlu1 %v912_v53, %s2169_s8 }
 0x5f9   :  { %v914_v54 = vpop.permute.xlu1 %913 }
 0x5fa   :  { %v915_v55 = vadd.f32 %v914_v54, %v912_v53 }
 0x5fc   :  { %916 = vrot.lane.b32.xlu0 %v915_v55, %s2172_s2 }
 0x66e   :  { %v917_v56 = vpop.permute.xlu0 %916 }
 0x66f   :  { %v918_v57 = vadd.f32 %v917_v56, %v915_v55 }
 0x671   :  { %919 = vrot.lane.b32.xlu1 %v918_v57, %s2173_s27 }
 0x6e3   :  { %v920_v58 = vpop.permute.xlu1 %919 }
 0x6e4   :  { %v921_v59 = vadd.f32 %v920_v58, %v918_v57 }
 0x6e6   :  { %922 = vrot.lane.b32.xlu0 %v921_v59, %s2174_s28 }
 0x758   :  { %v923_v60 = vpop.permute.xlu0 %922 }
 0x759   :  { %v2454_v62 = vadd.f32 %v923_v60, %v921_v59 }
 0x75b   :  { %925 = vrot.lane.b32.xlu1 %v2454_v62, %s2168_s7 }
 0x7cd   :  { %v926_v34 = vpop.permute.xlu1 %925 }
 0x7ce   :  { %v927_v35 = vadd.f32 %v926_v34, %v2454_v62 }
 0x7d0   :  { %v928_v36 = vmul.f32 0.001953125, %v927_v35  ;;  %v2076_v35 = vld [vmem:[#allocation6 + $0x158] sm:$0xff]  }
 0x7d2   :  { %v929_v37 = vadd.f32 1e-05, %v928_v36  ;;  %v2077_v36 = vld [vmem:[#allocation6 + $0x118] sm:$0xff]  }
 0x7d4   :  { %2091 = vrsqrt.f32 %v929_v37  ;;  %v2078_v37 = vld [vmem:[#allocation6 + $0x160] sm:$0xff]  }
 0x7de   :  { %v2092_v38 = vpop.eup %2091 }
 0x7df   :  { %v934_v39 = vrot.slane %v2092_v38, %v2398_v61  ;;  %v2079_v38 = vld [vmem:[#allocation6 + $0x120] sm:$0xff]  }
 0x7e1   :  { %v935_v41 = vmul.f32 %v934_v39, %v2442_v42  ;;  %v936_v45 = vmul.f32 %v934_v39, %v2444_v43  ;;  %v2080_v39 = vld [vmem:[#allocation6 + $0x168] sm:$0xff]  }
 0x7e3   :  { %v941_v47 = vmul.f32 %v1706_v40, %v935_v41  ;;  %v942_v48 = vmul.f32 %v1706_v40, %v936_v45  ;;  %v2081_v40 = vld [vmem:[#allocation6 + $0x128] sm:$0xff]   ;;  %v2082_v41 = vld [vmem:[#allocation6 + $0x170] sm:$0xff]  }
 0x7e4   :  { %v2083_v45 = vld [vmem:[#allocation6 + $0x130] sm:$0xff]  }
 0x7e5   :  { %v947_v49 = vadd.f32 %v1707_v46, %v941_v47  ;;  %v948_v50 = vadd.f32 %v1707_v46, %v942_v48  ;;  %v2084_v46 = vld [vmem:[#allocation6 + $0x178] sm:$0xff]  }
 0x7e6   :  { %v2085_v48 = vld [vmem:[#allocation6 + $0x138] sm:$0xff]  }
 0x7e7   :  { %v949_v51 = vmax.f32 %v947_v49, 0.0  ;;  %v950_v52 = vmax.f32 %v948_v50, 0.0 }
 0x7e9   :  { %v1768_v53 = vpack.c.bf16 %v949_v51, %v949_v51  ;;  %v1769_v54 = vpack.c.bf16 %v950_v52, %v950_v52 }
 0x7eb   :  { %v958_v55 = vshrl.u32 %v1768_v53, 16  ;;  %v966_v56 = vshrl.u32 %v1769_v54, 16  ;;  %v961_v58 = vshll.u32 %v1768_v53, 16  ;;  %v969_v42 = vshll.u32 %v1769_v54, 16 }
 0x7ed   :  { %v960_v57 = vrot.slane %v958_v55, 7  ;;  %v968_v59 = vrot.slane %v966_v56, 7 }
 0x7ef   :  { %v963_v60 = vor.u32 %v961_v58, %v960_v57  ;;  %v964_v43 = vrot.slane %v960_v57, 4  ;;  %v971_v62 = vor.u32 %v969_v42, %v968_v59  ;;  %v973_v63 = vrot.slane %v968_v59, 4 }
 0x7f1   :  { %v972_v2 = vsel %vm2417_vm3, %v964_v43, %v971_v62  ;;  %v978_v3 = vsel %vm2407_vm0, %v963_v60, %v977_v0  ;;  %v982_v4 = vsel %vm2376_vm5, %v973_v63, %v981_v1  ;;  %vm1003_vm5 = vsmask.f32 7424 }
 0x7f2   :  { %980 = vst [vmem:[#allocation2 + $0x8] sm:$0xf] %v972_v2  ;;  %979 = vst [vmem:[#allocation2] sm:$0xf] %v978_v3 }
 0x7f3   :  { %983 = vst [vmem:[#allocation2 + $0x10] sm:$0x1] %v982_v4 }
 0x7f9   :  { %v984_v5 = vld [vmem:[#allocation2] sm:$0xff]  ;;  %v985_v6 = vld [vmem:[#allocation2 + $0x8] sm:$0xff] }
 0x7fa   :  { %v986_v7 = vld [vmem:[#allocation2 + $0x10] sm:$0x11]  ;;  %v1710_v8 = vcombine.low %v984_v5, %v985_v6  ;;  %v1711_v9 = vcombine.high %v984_v5, %v985_v6  ;;  %v987_v12 = vld [vmem:[#allocation2] sm:$0xee] }
 0x7fb   :  { %v1712_v13 = vcombine.low %v986_v7, %v986_v7  ;;  %v1713_v28 = vcombine.high %v986_v7, %v986_v7  ;;  %v1715_v25 = vcombine.high %v987_v12, %v985_v6  ;;  %v1714_v47 = vcombine.low %v987_v12, %v985_v6 }
 0x7fc   :  { %v1019_v15 = vshll.u32 %v1711_v9, 16  ;;  %1459 = vmatprep.mubr.bf16.mxu0 %v1711_v9  ;;  %v1007_v17 = vshll.u32 %v1710_v8, 16  ;;  %v1017_v20 = vshrl.u32 %v1711_v9, 16  ;;  %v1005_v23 = vshrl.u32 %v1710_v8, 16 }
 0x7fd   :  { %v1039_v10 = vrot.slane %v1713_v28, 1  ;;  %v1024_v16 = vshll.u32 %v1713_v28, 16  ;;  %1460 = vmatmul.mubr.bf16.vlgmr.msra.gmra.mrb[8].mxu0 %v1710_v8  ;;  %v1038_v44 = vrot.slane %v1715_v25, 1  ;;  %v1012_v18 = vshll.u32 %v1712_v13, 16 }
 0x7fe   :  { %1916 = vmatpush3.bf16.msra.mxu0 %v2066_v11  ;;  %v1021_v21 = vrot.slane %v1019_v15, 1  ;;  %v1009_v24 = vrot.slane %v1007_v17, 1  ;;  %v1035_v49 = vrot.slane %v1714_v47, 1  ;;  %v1036_v50 = vrot.slane %v1712_v13, 1 }
 0x7ff   :  { %v1040_v22 = vsel %vm356_vm2, %v1038_v44, %v1039_v10  ;;  %1917 = vmatprep.subr.bf16.mxu0 %v2071_v14  ;;  %v1026_v29 = vrot.slane %v1024_v16, 1  ;;  %v1014_v31 = vrot.slane %v1012_v18, 1 }
 0x800   :  { %1541 = vmatprep.mubr.bf16.mxu0 %v1040_v22  ;;  %v1022_v27 = vor.u32 %v1021_v21, %v1017_v20  ;;  %v1010_v30 = vor.u32 %v1009_v24, %v1005_v23  ;;  %v1037_v51 = vsel %vm356_vm2, %v1035_v49, %v1036_v50 }
 0x802   :  { %1918 = vmatpush3.bf16.msra.mxu0 %v2073_v19  ;;  %v1027_v32 = vsel %vm1003_vm5, %v1022_v27, %v1026_v29  ;;  %v1015_v34 = vsel %vm1003_vm5, %v1010_v30, %v1014_v31 }
 0x803   :  { %1500 = vmatprep.mubr.bf16.mxu1 %v1027_v32  ;;  %1919 = vmatprep.subr.bf16.mxu0 %v2074_v26 }
 0x804   :  { %1501 = vmatmul.mubr.bf16.vlgmr.msra.gmra.mrb[12].mxu1 %v1015_v34 }
 0x806   :  { %1920 = vmatpush3.bf16.msra.mxu0 %v2075_v33 }
 0x807   :  { %1921 = vmatprep.subr.bf16.mxu0 %v2076_v35 }
 0x80a   :  { %1922 = vmatpush3.bf16.msra.mxu0 %v2077_v36 }
 0x80b   :  { %1923 = vmatprep.subr.bf16.mxu0 %v2078_v37 }
 0x80e   :  { %1924 = vmatpush3.bf16.msra.mxu0 %v2079_v38 }
 0x80f   :  { %1925 = vmatprep.subr.bf16.mxu0 %v2080_v39 }
 0x812   :  { %1926 = vmatpush3.bf16.msra.mxu0 %v2081_v40 }
 0x813   :  { %1927 = vmatprep.subr.bf16.mxu0 %v2082_v41 }
 0x816   :  { %1928 = vmatpush3.bf16.msra.mxu0 %v2083_v45 }
 0x817   :  { %1929 = vmatprep.subr.bf16.mxu0 %v2084_v46 }
 0x81a   :  { %1930 = vmatpush3.bf16.msra.mxu0 %v2085_v48 }
 0x81d   :  { %1542 = vmatmul.mubr.bf16.vlgmr.msra.gmra.mrb[12].mxu0 %v1037_v51 }
 0x8d0   :  { %v1887_v52 = vpop.f32.mrb[8].mxu0 }
 0x8d1   :  { %v1888_v53 = vpop.f32.mrb[9].mxu0 }
 0x8d2   :  { %v1889_v54 = vadd.f32 %v1888_v53, %v1887_v52  ;;  %v1890_v55 = vpop.f32.mrb[10].mxu0 }
 0x8d3   :  { %v1891_v56 = vpop.f32.mrb[11].mxu0 }
 0x8d4   :  { %v1892_v57 = vadd.f32 %v1891_v56, %v1890_v55  ;;  %v1764_v55 = vld [vmem:[%s2512_s5 + $0x2] ss:$0 sm:$0xff] }
 0x8d7   :  { %v1909_v58 = vpop.f32.mrb[12].mxu1 }
 0x8d8   :  { %v1910_v59 = vpop.f32.mrb[13].mxu1 }
 0x8d9   :  { %v1911_v42 = vadd.f32 %v1910_v59, %v1909_v58  ;;  %v1912_v60 = vpop.f32.mrb[14].mxu1  ;;  %v1765_v58 = vld [vmem:[%s2512_s5 + $0x3] ss:$0 sm:$0xff] }
 0x8da   :  { %v1913_v43 = vpop.f32.mrb[15].mxu1 }
 0x8db   :  { %v1503_v62 = vadd.f32 %v1911_v42, %v1889_v54  ;;  %v1914_v63 = vadd.f32 %v1913_v43, %v1912_v60 }
 0x8dd   :  { %v1506_v0 = vadd.f32 %v1914_v63, %v1892_v57 }
 0x8f0   :  { %v1931_v1 = vpop.f32.mrb[12].mxu0 }
 0x8f1   :  { %v1932_v2 = vpop.f32.mrb[13].mxu0 }
 0x8f2   :  { %v1933_v3 = vadd.f32 %v1932_v2, %v1931_v1  ;;  %v1934_v4 = vpop.f32.mrb[14].mxu0 }
 0x8f3   :  { %v1935_v5 = vpop.f32.mrb[15].mxu0 }
 0x8f4   :  { %v1544_v6 = vadd.f32 %v1933_v3, %v1503_v62  ;;  %v1936_v7 = vadd.f32 %v1935_v5, %v1934_v4 }
 0x8f6   :  { %v1547_v8 = vadd.f32 %v1936_v7, %v1506_v0 }
 0x8f8   :  { %v1552_v9 = vadd.f32 %v1547_v8, %v1544_v6 }
 0x8fa   :  { %v1553_v11 = vrot.slane %v1552_v9, 4 }
 0x8fc   :  { %v1554_v12 = vadd.f32 %v1553_v11, %v1552_v9 }
 0x8fe   :  { %v1555_v13 = vrot.slane %v1554_v12, 2 }
 0x900   :  { %v1556_v28 = vadd.f32 %v1555_v13, %v1554_v12 }
 0x902   :  { %v1557_v25 = vrot.slane %v1556_v28, 1 }
 0x904   :  { %v1558_v14 = vadd.f32 %v1557_v25, %v1556_v28 }
 0x906   :  { %1559 = vrot.lane.b32.xlu0 %v1558_v14, %s2169_s8 }
 0x978   :  { %v1560_v15 = vpop.permute.xlu0 %1559 }
 0x979   :  { %v1561_v10 = vadd.f32 %v1560_v15, %v1558_v14 }
 0x97b   :  { %1562 = vrot.lane.b32.xlu1 %v1561_v10, %s2172_s2 }
 0x9ed   :  { %v1563_v16 = vpop.permute.xlu1 %1562 }
 0x9ee   :  { %v1564_v44 = vadd.f32 %v1563_v16, %v1561_v10 }
 0x9f0   :  { %1565 = vrot.lane.b32.xlu0 %v1564_v44, %s2173_s27 }
 0xa62   :  { %v1566_v17 = vpop.permute.xlu0 %1565 }
 0xa63   :  { %v1567_v18 = vadd.f32 %v1566_v17, %v1564_v44 }
 0xa65   :  { %1568 = vrot.lane.b32.xlu1 %v1567_v18, %s2174_s28 }
 0xad7   :  { %v1569_v19 = vpop.permute.xlu1 %1568 }
 0xad8   :  { %v1570_v20 = vadd.f32 %v1569_v19, %v1567_v18 }
 0xada   :  { %1571 = vrot.lane.b32.xlu0 %v1570_v20, %s2168_s7 }
 0xb4c   :  { %v1572_v21 = vpop.permute.xlu0 %1571 }
 0xb4d   :  { %v1573_v22 = vadd.f32 %v1572_v21, %v1570_v20 }
 0xb4f   :  { %v1574_v23 = vmul.f32 0.001953125, %v1573_v22 }
 0xb51   :  { %v1578_v24 = vrot.slane %v1574_v23, %v2398_v61 }
 0xb53   :  { %v1579_v26 = vsub.f32 %v1544_v6, %v1578_v24  ;;  %v1580_v27 = vsub.f32 %v1547_v8, %v1578_v24 }
 0xb55   :  { %v1581_v29 = vmul.f32 %v1579_v26, %v1579_v26  ;;  %v1582_v30 = vmul.f32 %v1580_v27, %v1580_v27 }
 0xb57   :  { %v1583_v31 = vadd.f32 %v1582_v30, %v1581_v29 }
 0xb59   :  { %v1584_v32 = vrot.slane %v1583_v31, 4 }
 0xb5b   :  { %v1585_v33 = vadd.f32 %v1584_v32, %v1583_v31 }
 0xb5d   :  { %v1586_v34 = vrot.slane %v1585_v33, 2 }
 0xb5f   :  { %v1587_v35 = vadd.f32 %v1586_v34, %v1585_v33 }
 0xb61   :  { %v1588_v36 = vrot.slane %v1587_v35, 1 }
 0xb63   :  { %v1589_v37 = vadd.f32 %v1588_v36, %v1587_v35 }
 0xb65   :  { %1590 = vrot.lane.b32.xlu1 %v1589_v37, %s2169_s8 }
 0xbd7   :  { %v1591_v38 = vpop.permute.xlu1 %1590 }
 0xbd8   :  { %v1592_v39 = vadd.f32 %v1591_v38, %v1589_v37 }
 0xbda   :  { %1593 = vrot.lane.b32.xlu0 %v1592_v39, %s2172_s2 }
 0xc4c   :  { %v1594_v40 = vpop.permute.xlu0 %1593 }
 0xc4d   :  { %v1595_v41 = vadd.f32 %v1594_v40, %v1592_v39 }
 0xc4f   :  { %1596 = vrot.lane.b32.xlu1 %v1595_v41, %s2173_s27 }
 0xcc1   :  { %v1597_v45 = vpop.permute.xlu1 %1596 }
 0xcc2   :  { %v1598_v46 = vadd.f32 %v1597_v45, %v1595_v41 }
 0xcc4   :  { %1599 = vrot.lane.b32.xlu0 %v1598_v46, %s2174_s28 }
 0xd36   :  { %v1600_v47 = vpop.permute.xlu0 %1599 }
 0xd37   :  { %v1601_v48 = vadd.f32 %v1600_v47, %v1598_v46 }
 0xd39   :  { %1602 = vrot.lane.b32.xlu1 %v1601_v48, %s2168_s7  ;;  %s2175_s7 = smov [#allocation8]  }
 0xd3a   :  { %s1635_s13 = sshll.u32 %s2175_s7, 4  ;;  %s1636_s13 = int_to_ptr.vmem [resolvable:$true] %s1635_s13 }
 0xd3b   :  { %s2139_s14 = scalar_lea.vmem %s1636_s13, 256  ;;  %p2144_p3 = scmp.lt.s32.totalorder %s1636_s13, %s1636_s13 }
 0xd3c   :  { %p2140_p2 = scmp.ne.s32.totalorder %s1636_s13, %s2139_s14  ;;  %p2145_p4 = scmp.lt.s32.totalorder %s2139_s14, %s2139_s14 }
 0xd3e   :  { %p2146_p5 = por %p2145_p4, %p2144_p3 }
 0xd40   :  { %p2147_p6 = pnand %p2146_p5, %p2140_p2 }
 0xdab   :  { %v1603_v49 = vpop.permute.xlu1 %1602 }
 0xdac   :  { %v1604_v50 = vadd.f32 %v1603_v49, %v1601_v48 }
 0xdae   :  { %v1605_v51 = vmul.f32 0.001953125, %v1604_v50 }
 0xdb0   :  { %v1606_v52 = vadd.f32 1e-05, %v1605_v51 }
 0xdb2   :  { %2093 = vrsqrt.f32 %v1606_v52 }
 0xdbc   :  { %v2094_v53 = vpop.eup %2093 }
 0xdbd   :  { %v1611_v54 = vrot.slane %v2094_v53, %v2398_v61 }
 0xdbf   :  { %v1612_v56 = vmul.f32 %v1611_v54, %v1579_v26  ;;  %v1613_v57 = vmul.f32 %v1611_v54, %v1580_v27 }
 0xdc1   :  { %v1618_v59 = vmul.f32 %v1764_v55, %v1612_v56  ;;  %v1619_v42 = vmul.f32 %v1764_v55, %v1613_v57 }
 0xdc3   :  { %v1624_v60 = vadd.f32 %v1765_v58, %v1618_v59  ;;  %v1625_v43 = vadd.f32 %v1765_v58, %v1619_v42 }
 0xdc5   :  { %v1626_v62 = vmax.f32 %v1624_v60, 0.0  ;;  %v1627_v63 = vmax.f32 %v1625_v43, 0.0 }
 0xdc7   :  { %1628 = vst [vmem:[#allocation8] sm:$0xff] %v1626_v62  ;;  %1629 = vst [vmem:[#allocation8 + $0x8] sm:$0xff] %v1627_v63 }
 0xdc8   :  { %2150 = shalt.err (!%p2147_p6)
}
 0xdc9   :  { %s2151_s16 = scalar_lea.hbm %s2513_s6, 256 }
 0xdca   :  { %p2152_p7 = scmp.ne.s32.totalorder %s2513_s6, %s2151_s16  ;;  %p2155_p8 = scmp.lt.u32.totalorder %s2151_s16, %s2513_s6 }
 0xdcc   :  { %p2157_p9 = pnand %p2155_p8, %p2152_p7 }
 0xdce   :  { %2160 = shalt.err (!%p2157_p9)
}
 0xdcf   :  { %s2176_s3 = smov 128  }
 0xdd0   :  { %1641 = dma.vmem_to_hbm [thread:$0]  %s1636_s13, 256, %s2513_s6, [#allocation5], %s2176_s3, %s2176_s3, %s2172_s2  }
 0xdd1   :  { %2165 = dma.done.wait [#allocation5], 256  }
 0xdd2   :  { %2166 = vsyncadd [#allocation5], 4294967040 }
 0xdd3   :  { %1645 = vsyncpa [#allocation4], 1 }
 0xdd4   :  { %1646 = vsyncpa [#allocation7], 1 }
 0xdd5   :  { %1647 = vsyncpa [#allocation5], 1 }

</bundles_post_ra>
